<compile_context>
chip_gen: v7x
topology: tpu7x:2x2x1
jax: 0.10.0
libtpu: 0.0.40
codegen_flags: <defaults>
</compile_context>

<pallas_src>
import jax
import jax.numpy as jnp
from jax.experimental import pallas as pl
from jax.experimental.pallas import tpu as pltpu

_LANE = 128
_MAX_TILE = 1024  # lane-dense spatial tile cap (keeps per-step VMEM small on v7x/v5e)


def _dus_kernel(x_ref, w1_ref, s1_ref, b1_ref, w2_ref, s2_ref, b2_ref, o_ref):
    # x_ref : (1, C_in, T)      w1_ref : (C_mid, C_in)   s1/b1 : (C_mid, 1)
    # o_ref : (1, C_in, T)      w2_ref : (C_in, C_mid)   s2/b2 : (C_in, 1)
    x = x_ref[0]                                                    # (C_in, T), native dtype

    # downSample: conv1x1 (channel matmul) + folded BatchNorm affine.
    h = jnp.dot(w1_ref[...], x, preferred_element_type=jnp.float32)  # (C_mid, T) f32
    h = h * s1_ref[...] + b1_ref[...]

    # upSample: conv1x1 + folded BatchNorm affine.
    y = jnp.dot(w2_ref[...], h, preferred_element_type=jnp.float32)  # (C_in, T) f32
    y = y * s2_ref[...] + b2_ref[...]

    o_ref[0] = y.astype(o_ref.dtype)


def _fold_bn(bn, eps):
    """(gamma, beta, running_mean, running_var) -> per-channel (scale, shift) as (C, 1)."""
    g, b, m, v = (p.astype(jnp.float32) for p in bn)
    scale = g * jax.lax.rsqrt(v + eps)
    shift = b - m * scale
    return scale.reshape(-1, 1), shift.reshape(-1, 1)


def down_up_sample(x, w1, bn1, w2, bn2, *, eps=1e-5):
    """downUpSample forward (inference-mode BatchNorm).

    x   : (B, C_in, H, W)   NCHW
    w1  : (C_mid, C_in)     squeezed conv1x1 weight (downSample, bias=False)
    bn1 : (gamma, beta, running_mean, running_var), each (C_mid,)
    w2  : (C_in, C_mid)     squeezed conv1x1 weight (upSample, bias=False)
    bn2 : (gamma, beta, running_mean, running_var), each (C_in,)
    """
    B, C_in, H, W = x.shape
    C_mid = w1.shape[0]
    HW = H * W

    s1, b1 = _fold_bn(bn1, eps)
    s2, b2 = _fold_bn(bn2, eps)

    # Lane-dense spatial tiling: tile is a multiple of 128, pad HW up to it.
    tile = min(_MAX_TILE, -(-HW // _LANE) * _LANE)
    hw_pad = -(-HW // tile) * tile

    x_flat = x.reshape(B, C_in, HW)
    if hw_pad != HW:
        x_flat = jnp.pad(x_flat, ((0, 0), (0, 0), (0, hw_pad - HW)))

    grid = (B, hw_pad // tile)

    itemsize = jnp.dtype(x.dtype).itemsize
    flops = 4 * B * hw_pad * C_in * C_mid + 4 * B * hw_pad * (C_in + C_mid)
    bytes_accessed = (
        2 * B * C_in * hw_pad * itemsize            # read x, write out
        + (w1.size + w2.size) * 4                   # weights
        + 2 * (C_in + C_mid) * 4                    # folded BN scale/shift
    )

    out_flat = pl.pallas_call(
        _dus_kernel,
        out_shape=jax.ShapeDtypeStruct((B, C_in, hw_pad), x.dtype),
        grid_spec=pltpu.PrefetchScalarGridSpec(
            num_scalar_prefetch=0,
            grid=grid,
            in_specs=[
                pl.BlockSpec((1, C_in, tile), lambda b, t: (b, 0, t)),
                pl.BlockSpec((C_mid, C_in), lambda b, t: (0, 0)),
                pl.BlockSpec((C_mid, 1), lambda b, t: (0, 0)),
                pl.BlockSpec((C_mid, 1), lambda b, t: (0, 0)),
                pl.BlockSpec((C_in, C_mid), lambda b, t: (0, 0)),
                pl.BlockSpec((C_in, 1), lambda b, t: (0, 0)),
                pl.BlockSpec((C_in, 1), lambda b, t: (0, 0)),
            ],
            out_specs=pl.BlockSpec((1, C_in, tile), lambda b, t: (b, 0, t)),
        ),
        compiler_params=pltpu.CompilerParams(
            dimension_semantics=("parallel", "parallel"),
            vmem_limit_bytes=32 * 1024 * 1024,
        ),
        cost_estimate=pl.CostEstimate(
            flops=flops, transcendentals=0, bytes_accessed=bytes_accessed),
    )(x_flat, w1.astype(jnp.float32), s1, b1, w2.astype(jnp.float32), s2, b2)

    return out_flat[:, :, :HW].reshape(B, C_in, H, W)


def _reference(x, w1, bn1, w2, bn2, eps=1e-5):
    """Pure-JAX reference mirroring the PyTorch forward in eval() mode."""
    def bn_apply(z, bn):
        g, b, m, v = (p.astype(jnp.float32) for p in bn)
        zz = (z - m[None, :, None, None]) * jax.lax.rsqrt(v[None, :, None, None] + eps)
        return zz * g[None, :, None, None] + b[None, :, None, None]

    h = jnp.einsum("oc,bchw->bohw", w1.astype(jnp.float32), x.astype(jnp.float32))
    h = bn_apply(h, bn1)
    y = jnp.einsum("oc,bchw->bohw", w2.astype(jnp.float32), h)
    y = bn_apply(y, bn2)
    return y.astype(x.dtype)


if __name__ == "__main__":
    # Small shapes consistent with downUpSample(inplane=8, midplane=4).
    B, C_in, C_mid, H, W = 2, 8, 4, 16, 16

    key = jax.random.PRNGKey(0)
    kx, kw1, kw2, kg1, kb1, km1, kv1, kg2, kb2, km2, kv2 = jax.random.split(key, 11)

    x = jax.random.normal(kx, (B, C_in, H, W), dtype=jnp.float32)

    # Conv1x1 weights (torch shape (out, in, 1, 1) -> squeezed (out, in)).
    bound1 = 1.0 / (C_in ** 0.5)
    bound2 = 1.0 / (C_mid ** 0.5)
    w1 = jax.random.uniform(kw1, (C_mid, C_in), jnp.float32, -bound1, bound1)
    w2 = jax.random.uniform(kw2, (C_in, C_mid), jnp.float32, -bound2, bound2)

    # BatchNorm parameters / running statistics.
    bn1 = (
        jax.random.uniform(kg1, (C_mid,), jnp.float32, 0.5, 1.5),   # gamma
        jax.random.normal(kb1, (C_mid,), jnp.float32) * 0.1,        # beta
        jax.random.normal(km1, (C_mid,), jnp.float32) * 0.1,        # running_mean
        jax.random.uniform(kv1, (C_mid,), jnp.float32, 0.5, 1.5),   # running_var
    )
    bn2 = (
        jax.random.uniform(kg2, (C_in,), jnp.float32, 0.5, 1.5),
        jax.random.normal(kb2, (C_in,), jnp.float32) * 0.1,
        jax.random.normal(km2, (C_in,), jnp.float32) * 0.1,
        jax.random.uniform(kv2, (C_in,), jnp.float32, 0.5, 1.5),
    )

    out = jax.block_until_ready(down_up_sample(x, w1, bn1, w2, bn2))
    ref = _reference(x, w1, bn1, w2, bn2)

    assert out.shape == (B, C_in, H, W)
    assert jnp.allclose(out, ref, atol=1e-4, rtol=1e-4), "mismatch vs reference"
    print("KERNEL_OK")
</pallas_src>

<mosaic_0001>
module attributes {stable_mosaic.version = 11 : i64} {
  func.func @_dus_kernel(%arg0: i32, %arg1: i32, %arg2: memref<1x8x256xf32, #tpu.memory_space<vmem>>, %arg3: memref<4x8xf32, #tpu.memory_space<vmem>>, %arg4: memref<4x1xf32, #tpu.memory_space<vmem>>, %arg5: memref<4x1xf32, #tpu.memory_space<vmem>>, %arg6: memref<8x4xf32, #tpu.memory_space<vmem>>, %arg7: memref<8x1xf32, #tpu.memory_space<vmem>>, %arg8: memref<8x1xf32, #tpu.memory_space<vmem>>, %arg9: memref<1x8x256xf32, #tpu.memory_space<vmem>>) attributes {dimension_semantics = [#tpu.dimension_semantics<parallel>, #tpu.dimension_semantics<parallel>], iteration_bounds = array<i64: 2, 1>, scalar_prefetch = 0 : i64, scratch_operands = 0 : i64, tpu.core_type = #tpu.core_type<tc>, window_params = [{transform_indices = @transform_0, window_bounds = array<i64: 1, 8, 256>}, {pipeline_mode = #tpu.pipeline_mode<synchronous>, transform_indices = @transform_1, window_bounds = array<i64: 4, 8>}, {pipeline_mode = #tpu.pipeline_mode<synchronous>, transform_indices = @transform_2, window_bounds = array<i64: 4, 1>}, {pipeline_mode = #tpu.pipeline_mode<synchronous>, transform_indices = @transform_3, window_bounds = array<i64: 4, 1>}, {pipeline_mode = #tpu.pipeline_mode<synchronous>, transform_indices = @transform_4, window_bounds = array<i64: 8, 4>}, {pipeline_mode = #tpu.pipeline_mode<synchronous>, transform_indices = @transform_5, window_bounds = array<i64: 8, 1>}, {pipeline_mode = #tpu.pipeline_mode<synchronous>, transform_indices = @transform_6, window_bounds = array<i64: 8, 1>}, {transform_indices = @transform_7, window_bounds = array<i64: 1, 8, 256>}]} {
    %c0 = arith.constant 0 : index
    %c0_0 = arith.constant 0 : index
    %c0_1 = arith.constant 0 : index
    %0 = vector.load %arg2[%c0, %c0_0, %c0_1] : memref<1x8x256xf32, #tpu.memory_space<vmem>>, vector<1x8x256xf32>
    %1 = vector.shape_cast %0 : vector<1x8x256xf32> to vector<8x256xf32>
    %c0_2 = arith.constant 0 : index
    %c0_3 = arith.constant 0 : index
    %2 = vector.load %arg3[%c0_2, %c0_3] : memref<4x8xf32, #tpu.memory_space<vmem>>, vector<4x8xf32>
    %cst = arith.constant dense<0.000000e+00> : vector<4x256xf32>
    %3 = tpu.matmul %2, %1, %cst {dimension_numbers = #tpu.dot_dimension_numbers<[1], [0], [0], [1], [0, 0, 1, 1], [], []>} : vector<4x8xf32>, vector<8x256xf32>, vector<4x256xf32> -> vector<4x256xf32>
    %c0_4 = arith.constant 0 : index
    %c0_5 = arith.constant 0 : index
    %4 = vector.load %arg4[%c0_4, %c0_5] : memref<4x1xf32, #tpu.memory_space<vmem>>, vector<4x1xf32>
    %5 = vector.broadcast %4 : vector<4x1xf32> to vector<4x256xf32>
    %6 = arith.mulf %3, %5 : vector<4x256xf32>
    %c0_6 = arith.constant 0 : index
    %c0_7 = arith.constant 0 : index
    %7 = vector.load %arg5[%c0_6, %c0_7] : memref<4x1xf32, #tpu.memory_space<vmem>>, vector<4x1xf32>
    %8 = vector.broadcast %7 : vector<4x1xf32> to vector<4x256xf32>
    %9 = arith.addf %6, %8 : vector<4x256xf32>
    %c0_8 = arith.constant 0 : index
    %c0_9 = arith.constant 0 : index
    %10 = vector.load %arg6[%c0_8, %c0_9] : memref<8x4xf32, #tpu.memory_space<vmem>>, vector<8x4xf32>
    %cst_10 = arith.constant dense<0.000000e+00> : vector<8x256xf32>
    %11 = tpu.matmul %10, %9, %cst_10 {dimension_numbers = #tpu.dot_dimension_numbers<[1], [0], [0], [1], [0, 0, 1, 1], [], []>} : vector<8x4xf32>, vector<4x256xf32>, vector<8x256xf32> -> vector<8x256xf32>
    %c0_11 = arith.constant 0 : index
    %c0_12 = arith.constant 0 : index
    %12 = vector.load %arg7[%c0_11, %c0_12] : memref<8x1xf32, #tpu.memory_space<vmem>>, vector<8x1xf32>
    %13 = vector.broadcast %12 : vector<8x1xf32> to vector<8x256xf32>
    %14 = arith.mulf %11, %13 : vector<8x256xf32>
    %c0_13 = arith.constant 0 : index
    %c0_14 = arith.constant 0 : index
    %15 = vector.load %arg8[%c0_13, %c0_14] : memref<8x1xf32, #tpu.memory_space<vmem>>, vector<8x1xf32>
    %16 = vector.broadcast %15 : vector<8x1xf32> to vector<8x256xf32>
    %17 = arith.addf %14, %16 : vector<8x256xf32>
    %c0_15 = arith.constant 0 : index
    %c0_16 = arith.constant 0 : index
    %c0_17 = arith.constant 0 : index
    %18 = vector.load %arg9[%c0_15, %c0_16, %c0_17] : memref<1x8x256xf32, #tpu.memory_space<vmem>>, vector<1x8x256xf32>
    %19 = vector.shape_cast %18 : vector<1x8x256xf32> to vector<8x256xf32>
    %20 = vector.shape_cast %17 : vector<8x256xf32> to vector<1x8x256xf32>
    tpu.vector_store %arg9[%c0_15, %c0_16, %c0_17], %20 {strides = array<i32>} : memref<1x8x256xf32, #tpu.memory_space<vmem>>, vector<1x8x256xf32>,
    return
  }
  func.func @transform_0(%arg0: i32, %arg1: i32) -> (i32, i32, i32) {
    %c0_i32 = arith.constant 0 : i32
    %c0_i32_0 = arith.constant 0 : i32
    return %arg0, %c0_i32, %arg1 : i32, i32, i32
  }
  func.func @transform_1(%arg0: i32, %arg1: i32) -> (i32, i32) {
    %c0_i32 = arith.constant 0 : i32
    %c0_i32_0 = arith.constant 0 : i32
    %c0_i32_1 = arith.constant 0 : i32
    return %c0_i32, %c0_i32_0 : i32, i32
  }
  func.func @transform_2(%arg0: i32, %arg1: i32) -> (i32, i32) {
    %c0_i32 = arith.constant 0 : i32
    %c0_i32_0 = arith.constant 0 : i32
    %c0_i32_1 = arith.constant 0 : i32
    return %c0_i32, %c0_i32_0 : i32, i32
  }
  func.func @transform_3(%arg0: i32, %arg1: i32) -> (i32, i32) {
    %c0_i32 = arith.constant 0 : i32
    %c0_i32_0 = arith.constant 0 : i32
    %c0_i32_1 = arith.constant 0 : i32
    return %c0_i32, %c0_i32_0 : i32, i32
  }
  func.func @transform_4(%arg0: i32, %arg1: i32) -> (i32, i32) {
    %c0_i32 = arith.constant 0 : i32
    %c0_i32_0 = arith.constant 0 : i32
    %c0_i32_1 = arith.constant 0 : i32
    return %c0_i32, %c0_i32_0 : i32, i32
  }
  func.func @transform_5(%arg0: i32, %arg1: i32) -> (i32, i32) {
    %c0_i32 = arith.constant 0 : i32
    %c0_i32_0 = arith.constant 0 : i32
    %c0_i32_1 = arith.constant 0 : i32
    return %c0_i32, %c0_i32_0 : i32, i32
  }
  func.func @transform_6(%arg0: i32, %arg1: i32) -> (i32, i32) {
    %c0_i32 = arith.constant 0 : i32
    %c0_i32_0 = arith.constant 0 : i32
    %c0_i32_1 = arith.constant 0 : i32
    return %c0_i32, %c0_i32_0 : i32, i32
  }
  func.func @transform_7(%arg0: i32, %arg1: i32) -> (i32, i32, i32) {
    %c0_i32 = arith.constant 0 : i32
    %c0_i32_0 = arith.constant 0 : i32
    return %arg0, %c0_i32, %arg1 : i32, i32, i32
  }
}

</mosaic_0001>

<bundles_post_ra>
// kernel: tpu_custom_call.1
= control target key start
LH: loop header
LB: loop body
LE: loop exit
PB: predicated region body
PF: predicated region fallthrough
CT: control target
= control target key end

     0   :  { %12 = vsyncpa [#allocation3], 0  ;;  %s927_s0 = inlined_call_operand.vmem [shape: f32[2,8,256], index: 0, kind: input, shape index: {}]   ;;  %s928_s1 = inlined_call_operand.vmem [shape: f32[4,8], index: 1, kind: input, shape index: {}]   ;;  %s929_s2 = inlined_call_operand.vmem [shape: f32[4,1], index: 2, kind: input, shape index: {}]   ;;  %s930_s3 = inlined_call_operand.vmem [shape: f32[4,1], index: 3, kind: input, shape index: {}]   ;;  %s931_s4 = inlined_call_operand.vmem [shape: f32[8,4], index: 4, kind: input, shape index: {}]   ;;  %s932_s5 = inlined_call_operand.vmem [shape: f32[8,1], index: 5, kind: input, shape index: {}]   ;;  %s933_s6 = inlined_call_operand.vmem [shape: f32[8,1], index: 6, kind: input, shape index: {}]   ;;  %s934_s7 = inlined_call_operand.hbm [shape: f32[2,8,256], index: 7, kind: output, shape index: {}]  }
   0x1   :  { %14 = vsyncpa [#allocation3 + $0x1], 0  ;;  %s797_s24 = smov 0   ;;  %s799_s25 = smov 0  }
   0x2   :  { %s801_s26 = smov 0   ;;  %s803_s27 = smov 0  }
   0x3   :  { %s805_s28 = smov 0   ;;  %s807_s29 = smov 0  }
   0x4 LB: > { %s596_s30 = sadd.s32 4294967295, %s752_s29   ;;  %s597_s8 = sadd.s32 4294967294, %s752_s29   ;;  %s752_s29 = sphi %s807_s29, %s20_s29   ;;  %s748_s28 = sphi %s805_s28, %s941_s28   ;;  %s744_s27 = sphi %s803_s27, %s940_s27   ;;  %s740_s26 = sphi %s801_s26, %s939_s26   ;;  %s736_s25 = sphi %s799_s25, %s938_s25   ;;  %s732_s24 = sphi %s797_s24, %s937_s24  }
   0x5   : > { %s32_s9 = sadd.s32 1, %s748_s28  ;;  %s195_s10 = sadd.s32 1, %s740_s26 }
   0x6   : > { %p34_p0 = scmp.ge.s32.totalorder %s32_s9, 2  ;;  %p205_p1 = scmp.ne.s32.totalorder %s740_s26, %s736_s25 }
   0x7   : > { %p206_p2 = scmp.eq.s32.totalorder %s596_s30, 1  ;;  %p211_p3 = scmp.ne.s32.totalorder %s736_s25, %s732_s24 }
   0x8   : > { %s943_s9 = smov (%p34_p0, %s32_s9), 0  ;;  %p212_p5 = scmp.eq.s32.totalorder %s597_s8, 1 }
   0x9   : > { %p837_p4 = por %p206_p2, %p205_p1  ;;  %s190_s12 = ssub.s32 %s748_s28, %s943_s9 }
   0xa   : > { %p600_p6 = scmp.ge.s32.totalorder %s752_s29, 1  ;;  %p193_p7 = scmp.eq.s32.totalorder %s190_s12, 0 }
   0xb   : > { %p844_p8 = por %p212_p5, %p211_p3  ;;  %p261_p9 = scmp.lt.s32.totalorder %s752_s29, 3 }
   0xc   : > { %s850_s14 = scalar_select %p193_p7, %s740_s26, %s195_s10  }
   0xd   : > { %p262_p10 = pnand %p600_p6, %p261_p9 }
   0xe   : > { %p298_p11 = scmp.lt.s32.totalorder (!%p262_p10), %s744_s27, 1  ;;  %v754_v0 = vmov (!%p262_p10), 0.0   ;;  %v755_v1 = vmov (!%p262_p10), 0   ;;  %v386_v2 = vld [vmem:[%s929_s2] sm:$0xf] (!%p262_p10)  ;;  %vm311_vm0 = vcmask (!%p262_p10), 64512  }
   0xf   : > { %265 = sbr.rel (%p262_p10) target bundleno = 479 (0x1df), region = 48  ;;  %379 = vmatprep.mubr.f32.mxu0 (!%p262_p10), %v754_v0  ;;  %672 = vset.pattern.permute.xlu0 (!%p262_p10), %v755_v1  ;;  %v394_v3 = vld [vmem:[%s930_s3] sm:$0xf] (!%p262_p10)  ;;  %vm407_vm1 = vcmask (!%p262_p10), 1043456   ;;  %vm403_vm2 = vcmask (!%p262_p10), 31744   ;;  %s294_s19 = sand.u32 (!%p262_p10), 1, %s736_s25  }
  0x10   : > { %389 = vperm.xlu0 (!%p262_p10), %672, %v386_v2   ;;  %478 = vmatprep.mubr.f32.mxu1 (!%p262_p10), %v754_v0  ;;  %v310_v6 = vld [vmem:[%s928_s1] sm:$0xf] (!%p262_p10)  ;;  %s614_s21 = sshll.u32 (!%p262_p10), %s744_s27, 8  ;;  %s504_s12 = scalar_lea.sflag (!%p262_p10), [#allocation3], %s294_s19 }
  0x11   : > { %673 = vset.pattern.permute.xlu1 (!%p262_p10), %v755_v1  ;;  %v485_v7 = vld [vmem:[%s932_s5] sm:$0xff] (!%p262_p10)  ;;  %s880_s10 = scalar_lea.hbm (!%p262_p10), %s934_s7, %s614_s21  ;;  %s756_s15 = smov (!%p262_p10), [#allocation2]  }
  0x12   : > { %488 = vperm.xlu1 (!%p262_p10), %673, %v485_v7   ;;  %v493_v8 = vld [vmem:[%s933_s6] sm:$0xff] (!%p262_p10)  ;;  %s678_s16 = sshll.u32 (!%p262_p10), %s756_s15, 4  ;;  %s679_s16 = int_to_ptr.vmem [resolvable:$false] %s678_s16 }
  0x13   : > { %v402_v17 = vld [vmem:[%s931_s4] sm:$0xff] (!%p262_p10) }
  0x14   : > { %397 = vperm.xlu0 (!%p262_p10), %672, %v394_v3  }
  0x16   : > { %s299_s17 = scalar_select %p298_p11, %s744_s27, 1  ;;  %496 = vperm.xlu1 %673, %v493_v8  }
  0x18   : > { %s613_s20 = sshll.u32 %s299_s17, 4  ;;  %s680_s17 = scalar_lea.vmem %s679_s16, 512 }
  0x19   : > { %s305_s23 = scalar_lea.vmem %s927_s0, %s613_s20  ;;  %s601_s20 = sshll.u32 %s294_s19, 4 }
  0x1a   : > { %v309_v4 = vld [vmem:[%s305_s23 + $0x8] sm:$0xff]  ;;  %v308_v5 = vld [vmem:[%s305_s23] sm:$0xff]  ;;  %s296_s22 = scalar_lea.vmem [#allocation2], %s601_s20 }
  0x1b   : > { %315 = vmatprep.subr.mxu0 %v309_v4  ;;  %s520_s23 = sshll.u32 %s296_s22, 4  ;;  %s882_s23 = int_to_ptr.vmem [resolvable:$true] %s520_s23 }
  0x1c   : > { %316 = vmatpush1.msra.mxu0 %v308_v5  ;;  %s674_s27 = scalar_lea.vmem %s882_s23, 256  ;;  %p681_p1 = scmp.lt.s32.totalorder %s882_s23, %s679_s16 }
  0x1d   : > { %604 = vmatmul.mubr.msk.f32.vlgmr.msra.gmra.mrb[0].mxu0 %vm311_vm0, %v310_v6  ;;  %p675_p12 = scmp.ne.s32.totalorder %s882_s23, %s674_s27  ;;  %p682_p2 = scmp.lt.s32.totalorder %s680_s17, %s674_s27 }
  0x1f   : > { %p676_p13 = pnand %p675_p12, %p837_p4  ;;  %p683_p3 = por %p682_p2, %p681_p1 }
  0x21   : > { %p677_p0 = pneg %p676_p13 }
  0x23   : > { %p684_p5 = pnand %p683_p3, %p677_p0 }
  0x8f   : > { %v390_v9 = vpop.permute.xlu0 %389 }
  0x91   : > { %v489_v18 = vpop.permute.xlu1 %488 }
  0x93   : > { %v398_v14 = vpop.permute.xlu0 %397 }
  0x95   : > { %v497_v22 = vpop.permute.xlu1 %496 }
  0xf0   : > { %v381_v10 = vpop.f32.mrb[0].mxu0 }
  0xf1   : > { %v392_v11 = vmul.f32 %v390_v9, %v381_v10  ;;  %v383_v12 = vpop.f32.mrb[1].mxu0 }
  0xf2   : > { %v393_v13 = vmul.f32 %v390_v9, %v383_v12 }
  0xf3   : > { %v400_v16 = vadd.f32 %v398_v14, %v392_v11 }
  0xf4   : > { %v401_v15 = vadd.f32 %v398_v14, %v393_v13 }
  0xf6   : > { %605 = vmatprep.subr.msk.mxu1 %vm407_vm1, %v401_v15 }
  0xf7   : > { %606 = vmatpush1.msk.msra.mxu1 %vm407_vm1, %v400_v16 }
  0xf8   : > { %607 = vmatmul.mubr.msk.f32.vlgmr.msra.gmra.mrb[0].mxu1 %vm403_vm2, %v402_v17 }
 0x1cb   : > { %v480_v19 = vpop.f32.mrb[0].mxu1 }
 0x1cc   : > { %v491_v20 = vmul.f32 %v489_v18, %v480_v19  ;;  %v482_v21 = vpop.f32.mrb[1].mxu1 }
 0x1cd   : > { %v492_v23 = vmul.f32 %v489_v18, %v482_v21 }
 0x1ce   : > { %v499_v24 = vadd.f32 %v497_v22, %v491_v20 }
 0x1cf   : > { %v500_v25 = vadd.f32 %v497_v22, %v492_v23 }
 0x1d0   : > { %501 = vst [vmem:[%s296_s22] sm:$0xff] %v499_v24 }
 0x1d1   : > { %502 = vst [vmem:[%s296_s22 + $0x8] sm:$0xff] %v500_v25 }
 0x1d2   : > { %687 = shalt.err (!%p684_p5)
}
 0x1d3   : > { %s688_s18 = scalar_lea.hbm %s880_s10, 256  ;;  %s692_s21 = scalar_lea.hbm %s934_s7, 512 }
 0x1d4   : > { %p689_p6 = scmp.ne.s32.totalorder %s880_s10, %s688_s18  ;;  %p693_p10 = scmp.lt.u32.totalorder %s880_s10, %s934_s7 }
 0x1d5   : > { %p694_p11 = scmp.lt.u32.totalorder %s692_s21, %s688_s18  ;;  %p696_p13 = scmp.lt.u32.totalorder %s688_s18, %s880_s10 }
 0x1d6   : > { %p690_p7 = pnand %p689_p6, %p837_p4 }
 0x1d7   : > { %p695_p12 = por %p694_p11, %p693_p10 }
 0x1d8   : > { %p691_p9 = pneg %p690_p7 }
 0x1d9   : > { %p697_p0 = por %p696_p13, %p695_p12 }
 0x1db   : > { %p698_p1 = pnand %p697_p0, %p691_p9 }
 0x1dd   : > { %701 = shalt.err (!%p698_p1)
}
 0x1de   : > { %615 = dma.vmem_to_hbm [thread:$0]  (%p837_p4), %s882_s23, 256, %s880_s10, %s504_s12  }
 0x1df PF: > { %p621_p2 = scmp.ge.s32.totalorder %s752_s29, 2  ;;  %s532_s8 = sand.u32 1, %s732_s24  }
 0x1e0   : > { %s533_s27 = scalar_lea.sflag [#allocation3], %s532_s8 }
 0x1e1   : > { %p618_p3 = pnand %p621_p2, %p844_p8 }
 0x1e3   : > { %727 = dma.done.wait (!%p618_p3), %s533_s27, 256  }
 0x1e4   : > { %729 = vsyncadd (!%p618_p3), %s533_s27, 4294967040  ;;  %s20_s29 = sadd.s32 1, %s752_s29   ;;  %s937_s24 = smov %s736_s25 }
 0x1e5   : > { %p17_p5 = scmp.ge.s32.totalorder %s20_s29, 4   ;;  %s938_s25 = smov %s740_s26 }
 0x1e6   : > { %s939_s26 = smov %s850_s14  ;;  %s940_s27 = smov %s748_s28 }
 0x1e7   : > { %s941_s28 = smov %s943_s9  ;;  %19 = sbr.rel (!%p17_p5) target bundleno = 4 (0x4), region = 83 }
 0x1ee   :  { %538 = vsyncpa [#allocation3], 1 }
 0x1ef   :  { %540 = vsyncpa [#allocation3 + $0x1], 1 }

</bundles_post_ra>
